<compile_context>
chip_gen: v5e
topology: v5e:2x2
jax: 0.10.0
libtpu: 0.0.40
codegen_flags: <defaults>
</compile_context>

<pallas_src>
import functools

import jax
import jax.numpy as jnp
from jax.experimental import pallas as pl
from jax.experimental.pallas import tpu as pltpu


def _round_up(n, m):
    return ((n + m - 1) // m) * m


def _cdiv(a, b):
    return (a + b - 1) // b


def _sublane_granularity(dtype):
    # f32 -> 8 sublanes, bf16 -> 16, int8/fp8 -> 32 (sub-32-bit packs sublanes).
    return max(8, 32 // jnp.dtype(dtype).itemsize)


def _tensorcores_per_chip():
    """Best-effort TensorCores-per-chip detection (megacore chips report 2).

    Only influences tile-size defaults, never correctness.
    """
    try:
        kind = jax.devices()[0].device_kind.lower()
    except Exception:
        return 1
    return 2 if any(tag in kind for tag in ("v4", "v5p", "v7", "7x")) else 1


def _choose_batch_tile(batch, x_dtype, batch_tile, cores):
    gran = _sublane_granularity(x_dtype)
    if batch_tile is None:
        # Single-TC chips (v5e/v6e): big tiles amortize the ~0.35 us/step
        # overhead; measured tile scaling flattens around 1024 rows and the
        # VMEM footprint stays in the hundreds of KB.
        batch_tile = 1024
    batch_tile = max(gran, _round_up(batch_tile, gran))
    tb = min(batch_tile, _round_up(batch, gran))
    if cores >= 2 and batch >= 1024:
        # Megacore (v4 / v5p / v7x): even number of *balanced* grid steps so
        # both TensorCores get equal work; per-step rows stay >= 512 when the
        # batch allows.
        n_steps = 2
        while _cdiv(batch, n_steps) > batch_tile:
            n_steps += 2
        tb = _round_up(_cdiv(batch, n_steps), gran)
    return tb


def _encoder_mlp_kernel(x_ref, w1_ref, b1_ref, w2_ref, b2_ref,
                        w3m_ref, b3m_ref, w3l_ref, b3l_ref,
                        mean_ref, logvar_ref):
    # In-kernel cast keeps the bf16 MXU fast path (v5e/v6e/v7x) with zero extra
    # HBM traffic; it's a no-op when weights are f32.
    x = x_ref[...].astype(w1_ref.dtype)
    # Layer 1: Linear + ReLU (MXU, f32 accumulation, f32 bias).
    h = jnp.dot(x, w1_ref[...], preferred_element_type=jnp.float32) + b1_ref[...]
    h = jnp.maximum(h, 0.0)
    # Layer 2: Linear + ReLU.
    h = jnp.dot(h.astype(w2_ref.dtype), w2_ref[...],
                preferred_element_type=jnp.float32) + b2_ref[...]
    h = jnp.maximum(h, 0.0)
    h = h.astype(w3m_ref.dtype)
    # Layer 3: Linear, split into mean / logvar halves so the kernel writes
    # exactly the bytes needed (no 128-wide output padding, no post-kernel
    # chunk/slice pass).
    mean_ref[...] = (jnp.dot(h, w3m_ref[...], preferred_element_type=jnp.float32)
                     + b3m_ref[...]).astype(mean_ref.dtype)
    logvar_ref[...] = (jnp.dot(h, w3l_ref[...], preferred_element_type=jnp.float32)
                       + b3l_ref[...]).astype(logvar_ref.dtype)


def prepare_encoder_params(params, latent_dim, compute_dtype=None):
    """One-time param prep (hoisted out of the per-call forward).

    Casts weights to `compute_dtype` (bf16 is profitable on v5e/v6e/v7x; f32
    accumulation is preserved either way), reshapes biases to (1, n) f32, and
    splits the last layer into mean / logvar halves so the kernel can write the
    two chunked outputs directly.
    """
    w3, b3 = params["w3"], params["b3"]
    assert w3.shape[1] == 2 * latent_dim
    cd = params["w1"].dtype if compute_dtype is None else compute_dtype
    return {
        "w1": params["w1"].astype(cd),
        "b1": params["b1"].reshape(1, -1).astype(jnp.float32),
        "w2": params["w2"].astype(cd),
        "b2": params["b2"].reshape(1, -1).astype(jnp.float32),
        "w3m": w3[:, :latent_dim].astype(cd),
        "w3l": w3[:, latent_dim:].astype(cd),
        "b3m": b3[:latent_dim].reshape(1, -1).astype(jnp.float32),
        "b3l": b3[latent_dim:].reshape(1, -1).astype(jnp.float32),
    }


def encoder_forward(x, prep, latent_dim, *, batch_tile=None, num_tensorcores=None):
    """Fused MLP encoder in one Pallas kernel.

    Args:
      x: (batch, input_dim) array (f32 or bf16); fed to the kernel untouched.
      prep: output of prepare_encoder_params().
      latent_dim: latent dimension (static).
      batch_tile: rows per grid step (None -> auto: 1024 on single-TC chips).
      num_tensorcores: override TensorCores-per-chip detection (static).

    Returns:
      (mean, logvar), each (batch, latent_dim) -- mirrors torch .chunk(2, dim=1)
    """
    batch, in_dim = x.shape
    w1, b1 = prep["w1"], prep["b1"]
    w2, b2 = prep["w2"], prep["b2"]
    w3m, b3m = prep["w3m"], prep["b3m"]
    w3l, b3l = prep["w3l"], prep["b3l"]
    h1, h2 = w1.shape[1], w2.shape[1]
    assert w1.shape[0] == in_dim
    assert w3m.shape[1] == latent_dim and w3l.shape[1] == latent_dim

    cores = _tensorcores_per_chip() if num_tensorcores is None else num_tensorcores
    tb = _choose_batch_tile(batch, x.dtype, batch_tile, cores)
    grid = (_cdiv(batch, tb),)  # ragged batch handled by the partial trailing block

    out_dtype = x.dtype
    full = lambda a: pl.BlockSpec(a.shape, lambda i: (0, 0))  # fetched once, re-used

    flops = 2 * batch * (in_dim * h1 + h1 * h2 + h2 * 2 * latent_dim)
    bytes_accessed = int(
        x.size * x.dtype.itemsize
        + sum(a.size * a.dtype.itemsize
              for a in (w1, b1, w2, b2, w3m, b3m, w3l, b3l))
        + 2 * batch * latent_dim * jnp.dtype(out_dtype).itemsize)

    mean, logvar = pl.pallas_call(
        _encoder_mlp_kernel,
        out_shape=(jax.ShapeDtypeStruct((batch, latent_dim), out_dtype),
                   jax.ShapeDtypeStruct((batch, latent_dim), out_dtype)),
        grid=grid,
        in_specs=[
            pl.BlockSpec((tb, in_dim), lambda i: (i, 0)),  # x, tiled over batch
            full(w1), full(b1),
            full(w2), full(b2),
            full(w3m), full(b3m),
            full(w3l), full(b3l),
        ],
        out_specs=(pl.BlockSpec((tb, latent_dim), lambda i: (i, 0)),
                   pl.BlockSpec((tb, latent_dim), lambda i: (i, 0))),
        compiler_params=pltpu.CompilerParams(
            dimension_semantics=("parallel",)),
        cost_estimate=pl.CostEstimate(flops=flops, transcendentals=0,
                                      bytes_accessed=bytes_accessed),
    )(x, w1, b1, w2, b2, w3m, b3m, w3l, b3l)
    return mean, logvar


def init_encoder_params(key, input_dim, hidden_dims, latent_dim):
    """Weights stored pre-transposed as (in, out); U(-1/sqrt(fan_in), +) init."""
    dims = [input_dim] + list(hidden_dims) + [2 * latent_dim]
    params = {}
    for li, (d_in, d_out) in enumerate(zip(dims[:-1], dims[1:]), start=1):
        key, kw, kb = jax.random.split(key, 3)
        bound = 1.0 / jnp.sqrt(d_in)
        params[f"w{li}"] = jax.random.uniform(
            kw, (d_in, d_out), jnp.float32, -bound, bound)
        params[f"b{li}"] = jax.random.uniform(
            kb, (d_out,), jnp.float32, -bound, bound)
    return params


def _reference_forward(x, params, latent_dim):
    h = jnp.maximum(x @ params["w1"] + params["b1"], 0.0)
    h = jnp.maximum(h @ params["w2"] + params["b2"], 0.0)
    o = h @ params["w3"] + params["b3"]
    return o[:, :latent_dim], o[:, latent_dim:]


if __name__ == "__main__":
    # TODO(synk): save_onnx (ONNX export) has no Pallas equivalent; omitted.
    input_dim = 16
    hidden_dims = [32, 32]
    latent_dim = 8

    key = jax.random.PRNGKey(0)
    key, kx1, kx2 = jax.random.split(key, 3)
    params = init_encoder_params(key, input_dim, hidden_dims, latent_dim)

    # One-time param prep (hoisted out of the forward).
    prep_f32 = prepare_encoder_params(params, latent_dim)                     # exact
    prep_bf16 = prepare_encoder_params(params, latent_dim, jnp.bfloat16)      # MXU fast path

    # --- small exact (f32) check ------------------------------------------
    batch = 16
    x = jax.random.normal(kx1, (batch, input_dim), jnp.float32)
    fwd = jax.jit(functools.partial(encoder_forward, latent_dim=latent_dim))
    mean, logvar = fwd(x, prep_f32)
    jax.block_until_ready((mean, logvar))
    ref_mean, ref_logvar = _reference_forward(x, params, latent_dim)
    assert mean.shape == (batch, latent_dim)
    assert logvar.shape == (batch, latent_dim)
    assert jnp.allclose(mean, ref_mean, atol=1e-5, rtol=1e-5)
    assert jnp.allclose(logvar, ref_logvar, atol=1e-5, rtol=1e-5)

    # --- ragged batch (partial trailing block) + bf16 operand path ----------
    batch2 = 200  # not a multiple of the tile -> exercises the masked last block
    x2 = jax.random.normal(kx2, (batch2, input_dim), jnp.float32)
    fwd_bf16 = jax.jit(functools.partial(
        encoder_forward, latent_dim=latent_dim, batch_tile=64))
    mean2, logvar2 = fwd_bf16(x2, prep_bf16)
    jax.block_until_ready((mean2, logvar2))
    ref_mean2, ref_logvar2 = _reference_forward(x2, params, latent_dim)
    assert mean2.shape == (batch2, latent_dim)
    assert logvar2.shape == (batch2, latent_dim)
    assert jnp.allclose(mean2, ref_mean2, atol=5e-2, rtol=5e-2)
    assert jnp.allclose(logvar2, ref_logvar2, atol=5e-2, rtol=5e-2)

    print("KERNEL_OK")
</pallas_src>

<mosaic_0001>
module attributes {stable_mosaic.version = 11 : i64} {
  func.func @_encoder_mlp_kernel(%arg0: i32, %arg1: memref<16x16xf32, #tpu.memory_space<vmem>>, %arg2: memref<16x32xf32, #tpu.memory_space<vmem>>, %arg3: memref<1x32xf32, #tpu.memory_space<vmem>>, %arg4: memref<32x32xf32, #tpu.memory_space<vmem>>, %arg5: memref<1x32xf32, #tpu.memory_space<vmem>>, %arg6: memref<32x8xf32, #tpu.memory_space<vmem>>, %arg7: memref<1x8xf32, #tpu.memory_space<vmem>>, %arg8: memref<32x8xf32, #tpu.memory_space<vmem>>, %arg9: memref<1x8xf32, #tpu.memory_space<vmem>>, %arg10: memref<16x8xf32, #tpu.memory_space<vmem>>, %arg11: memref<16x8xf32, #tpu.memory_space<vmem>>) attributes {dimension_semantics = [#tpu.dimension_semantics<parallel>], iteration_bounds = array<i64: 1>, scalar_prefetch = 0 : i64, scratch_operands = 0 : i64, tpu.core_type = #tpu.core_type<tc>, window_params = [{transform_indices = @transform_0, window_bounds = array<i64: 16, 16>}, {pipeline_mode = #tpu.pipeline_mode<synchronous>, transform_indices = @transform_1, window_bounds = array<i64: 16, 32>}, {pipeline_mode = #tpu.pipeline_mode<synchronous>, transform_indices = @transform_2, window_bounds = array<i64: 1, 32>}, {pipeline_mode = #tpu.pipeline_mode<synchronous>, transform_indices = @transform_3, window_bounds = array<i64: 32, 32>}, {pipeline_mode = #tpu.pipeline_mode<synchronous>, transform_indices = @transform_4, window_bounds = array<i64: 1, 32>}, {pipeline_mode = #tpu.pipeline_mode<synchronous>, transform_indices = @transform_5, window_bounds = array<i64: 32, 8>}, {pipeline_mode = #tpu.pipeline_mode<synchronous>, transform_indices = @transform_6, window_bounds = array<i64: 1, 8>}, {pipeline_mode = #tpu.pipeline_mode<synchronous>, transform_indices = @transform_7, window_bounds = array<i64: 32, 8>}, {pipeline_mode = #tpu.pipeline_mode<synchronous>, transform_indices = @transform_8, window_bounds = array<i64: 1, 8>}, {transform_indices = @transform_9, window_bounds = array<i64: 16, 8>}, {transform_indices = @transform_10, window_bounds = array<i64: 16, 8>}]} {
    %c0 = arith.constant 0 : index
    %c0_0 = arith.constant 0 : index
    %0 = vector.load %arg1[%c0, %c0_0] : memref<16x16xf32, #tpu.memory_space<vmem>>, vector<16x16xf32>
    %c0_1 = arith.constant 0 : index
    %c0_2 = arith.constant 0 : index
    %1 = vector.load %arg2[%c0_1, %c0_2] : memref<16x32xf32, #tpu.memory_space<vmem>>, vector<16x32xf32>
    %cst = arith.constant dense<0.000000e+00> : vector<16x32xf32>
    %2 = tpu.matmul %0, %1, %cst {dimension_numbers = #tpu.dot_dimension_numbers<[1], [0], [0], [1], [0, 0, 1, 1], [], []>} : vector<16x16xf32>, vector<16x32xf32>, vector<16x32xf32> -> vector<16x32xf32>
    %c0_3 = arith.constant 0 : index
    %c0_4 = arith.constant 0 : index
    %3 = vector.load %arg3[%c0_3, %c0_4] : memref<1x32xf32, #tpu.memory_space<vmem>>, vector<1x32xf32>
    %4 = vector.broadcast %3 : vector<1x32xf32> to vector<16x32xf32>
    %5 = arith.addf %2, %4 : vector<16x32xf32>
    %cst_5 = arith.constant 0.000000e+00 : f32
    %6 = vector.broadcast %cst_5 : f32 to vector<16x32xf32>
    %7 = arith.maximumf %5, %6 : vector<16x32xf32>
    %c0_6 = arith.constant 0 : index
    %c0_7 = arith.constant 0 : index
    %8 = vector.load %arg4[%c0_6, %c0_7] : memref<32x32xf32, #tpu.memory_space<vmem>>, vector<32x32xf32>
    %cst_8 = arith.constant dense<0.000000e+00> : vector<16x32xf32>
    %9 = tpu.matmul %7, %8, %cst_8 {dimension_numbers = #tpu.dot_dimension_numbers<[1], [0], [0], [1], [0, 0, 1, 1], [], []>} : vector<16x32xf32>, vector<32x32xf32>, vector<16x32xf32> -> vector<16x32xf32>
    %c0_9 = arith.constant 0 : index
    %c0_10 = arith.constant 0 : index
    %10 = vector.load %arg5[%c0_9, %c0_10] : memref<1x32xf32, #tpu.memory_space<vmem>>, vector<1x32xf32>
    %11 = vector.broadcast %10 : vector<1x32xf32> to vector<16x32xf32>
    %12 = arith.addf %9, %11 : vector<16x32xf32>
    %cst_11 = arith.constant 0.000000e+00 : f32
    %13 = vector.broadcast %cst_11 : f32 to vector<16x32xf32>
    %14 = arith.maximumf %12, %13 : vector<16x32xf32>
    %c0_12 = arith.constant 0 : index
    %c0_13 = arith.constant 0 : index
    %15 = vector.load %arg6[%c0_12, %c0_13] : memref<32x8xf32, #tpu.memory_space<vmem>>, vector<32x8xf32>
    %cst_14 = arith.constant dense<0.000000e+00> : vector<16x8xf32>
    %16 = tpu.matmul %14, %15, %cst_14 {dimension_numbers = #tpu.dot_dimension_numbers<[1], [0], [0], [1], [0, 0, 1, 1], [], []>} : vector<16x32xf32>, vector<32x8xf32>, vector<16x8xf32> -> vector<16x8xf32>
    %c0_15 = arith.constant 0 : index
    %c0_16 = arith.constant 0 : index
    %17 = vector.load %arg7[%c0_15, %c0_16] : memref<1x8xf32, #tpu.memory_space<vmem>>, vector<1x8xf32>
    %18 = vector.broadcast %17 : vector<1x8xf32> to vector<16x8xf32>
    %19 = arith.addf %16, %18 : vector<16x8xf32>
    %c0_17 = arith.constant 0 : index
    %c0_18 = arith.constant 0 : index
    %20 = vector.load %arg10[%c0_17, %c0_18] : memref<16x8xf32, #tpu.memory_space<vmem>>, vector<16x8xf32>
    tpu.vector_store %arg10[%c0_17, %c0_18], %19 {strides = array<i32>} : memref<16x8xf32, #tpu.memory_space<vmem>>, vector<16x8xf32>,
    %c0_19 = arith.constant 0 : index
    %c0_20 = arith.constant 0 : index
    %21 = vector.load %arg8[%c0_19, %c0_20] : memref<32x8xf32, #tpu.memory_space<vmem>>, vector<32x8xf32>
    %cst_21 = arith.constant dense<0.000000e+00> : vector<16x8xf32>
    %22 = tpu.matmul %14, %21, %cst_21 {dimension_numbers = #tpu.dot_dimension_numbers<[1], [0], [0], [1], [0, 0, 1, 1], [], []>} : vector<16x32xf32>, vector<32x8xf32>, vector<16x8xf32> -> vector<16x8xf32>
    %c0_22 = arith.constant 0 : index
    %c0_23 = arith.constant 0 : index
    %23 = vector.load %arg9[%c0_22, %c0_23] : memref<1x8xf32, #tpu.memory_space<vmem>>, vector<1x8xf32>
    %24 = vector.broadcast %23 : vector<1x8xf32> to vector<16x8xf32>
    %25 = arith.addf %22, %24 : vector<16x8xf32>
    %c0_24 = arith.constant 0 : index
    %c0_25 = arith.constant 0 : index
    %26 = vector.load %arg11[%c0_24, %c0_25] : memref<16x8xf32, #tpu.memory_space<vmem>>, vector<16x8xf32>
    tpu.vector_store %arg11[%c0_24, %c0_25], %25 {strides = array<i32>} : memref<16x8xf32, #tpu.memory_space<vmem>>, vector<16x8xf32>,
    return
  }
  func.func @transform_0(%arg0: i32) -> (i32, i32) {
    %c0_i32 = arith.constant 0 : i32
    %c0_i32_0 = arith.constant 0 : i32
    return %arg0, %c0_i32 : i32, i32
  }
  func.func @transform_1(%arg0: i32) -> (i32, i32) {
    %c0_i32 = arith.constant 0 : i32
    %c0_i32_0 = arith.constant 0 : i32
    %c0_i32_1 = arith.constant 0 : i32
    return %c0_i32, %c0_i32_0 : i32, i32
  }
  func.func @transform_2(%arg0: i32) -> (i32, i32) {
    %c0_i32 = arith.constant 0 : i32
    %c0_i32_0 = arith.constant 0 : i32
    %c0_i32_1 = arith.constant 0 : i32
    return %c0_i32, %c0_i32_0 : i32, i32
  }
  func.func @transform_3(%arg0: i32) -> (i32, i32) {
    %c0_i32 = arith.constant 0 : i32
    %c0_i32_0 = arith.constant 0 : i32
    %c0_i32_1 = arith.constant 0 : i32
    return %c0_i32, %c0_i32_0 : i32, i32
  }
  func.func @transform_4(%arg0: i32) -> (i32, i32) {
    %c0_i32 = arith.constant 0 : i32
    %c0_i32_0 = arith.constant 0 : i32
    %c0_i32_1 = arith.constant 0 : i32
    return %c0_i32, %c0_i32_0 : i32, i32
  }
  func.func @transform_5(%arg0: i32) -> (i32, i32) {
    %c0_i32 = arith.constant 0 : i32
    %c0_i32_0 = arith.constant 0 : i32
    %c0_i32_1 = arith.constant 0 : i32
    return %c0_i32, %c0_i32_0 : i32, i32
  }
  func.func @transform_6(%arg0: i32) -> (i32, i32) {
    %c0_i32 = arith.constant 0 : i32
    %c0_i32_0 = arith.constant 0 : i32
    %c0_i32_1 = arith.constant 0 : i32
    return %c0_i32, %c0_i32_0 : i32, i32
  }
  func.func @transform_7(%arg0: i32) -> (i32, i32) {
    %c0_i32 = arith.constant 0 : i32
    %c0_i32_0 = arith.constant 0 : i32
    %c0_i32_1 = arith.constant 0 : i32
    return %c0_i32, %c0_i32_0 : i32, i32
  }
  func.func @transform_8(%arg0: i32) -> (i32, i32) {
    %c0_i32 = arith.constant 0 : i32
    %c0_i32_0 = arith.constant 0 : i32
    %c0_i32_1 = arith.constant 0 : i32
    return %c0_i32, %c0_i32_0 : i32, i32
  }
  func.func @transform_9(%arg0: i32) -> (i32, i32) {
    %c0_i32 = arith.constant 0 : i32
    %c0_i32_0 = arith.constant 0 : i32
    return %arg0, %c0_i32 : i32, i32
  }
  func.func @transform_10(%arg0: i32) -> (i32, i32) {
    %c0_i32 = arith.constant 0 : i32
    %c0_i32_0 = arith.constant 0 : i32
    return %arg0, %c0_i32 : i32, i32
  }
}

</mosaic_0001>

<bundles_post_ra>
// kernel: encoder_forward.1
= control target key start
LH: loop header
LB: loop body
LE: loop exit
PB: predicated region body
PF: predicated region fallthrough
CT: control target
= control target key end

     0   :  { %vm42_vm0 = vcmask 130048   ;;  %vm82_vm1 = vcmask 261120   ;;  %vm151_vm2 = vcmask 64512   ;;  %s340_s1 = inlined_call_operand.vmem [shape: f32[16,32], index: 1, kind: input, shape index: {}]   ;;  %s341_s0 = inlined_call_operand.vmem [shape: f32[16,16], index: 0, kind: input, shape index: {}]   ;;  %s342_s3 = inlined_call_operand.vmem [shape: f32[32,32], index: 3, kind: input, shape index: {}]   ;;  %s343_s2 = inlined_call_operand.vmem [shape: f32[1,32], index: 2, kind: input, shape index: {}]   ;;  %s344_s4 = inlined_call_operand.vmem [shape: f32[1,32], index: 4, kind: input, shape index: {}]   ;;  %s345_s5 = inlined_call_operand.vmem [shape: f32[32,8], index: 5, kind: input, shape index: {}]   ;;  %s346_s7 = inlined_call_operand.vmem [shape: f32[32,8], index: 7, kind: input, shape index: {}]   ;;  %s347_s6 = inlined_call_operand.vmem [shape: f32[1,8], index: 6, kind: input, shape index: {}]   ;;  %s348_s8 = inlined_call_operand.vmem [shape: f32[1,8], index: 8, kind: input, shape index: {}]   ;;  %s349_s9 = inlined_call_operand.vmem [shape: f32[16,8], index: 9, kind: output, shape index: {0}]   ;;  %s350_s10 = inlined_call_operand.vmem [shape: f32[16,8], index: 10, kind: output, shape index: {1}]  }
   0x1   :  { %v37_v0 = vld [vmem:[%s340_s1 + $0x8] sm:$0xff]  ;;  %v36_v1 = vld [vmem:[%s340_s1] sm:$0xff]  ;;  %v77_v3 = vld [vmem:[%s342_s3 + $0x18] sm:$0xff] }
   0x2   :  { %63 = vmatpush.msra.mxu0 %v37_v0  ;;  %v34_v2 = vld [vmem:[%s341_s0] sm:$0xff]  ;;  %101 = vmatpush.msra.mxu1 %v77_v3  ;;  %v35_v4 = vld [vmem:[%s341_s0 + $0x8] sm:$0xff]  ;;  %v76_v5 = vld [vmem:[%s342_s3 + $0x10] sm:$0xff] }
   0x3   :  { %v75_v6 = vld [vmem:[%s342_s3 + $0x8] sm:$0xff]  ;;  %v74_v7 = vld [vmem:[%s342_s3] sm:$0xff]  ;;  %v117_v8 = vld [vmem:[%s345_s5 + $0x18] sm:$0xff] }
   0x4   :  { %64 = vmatpush.msra.mxu0 %v36_v1  ;;  %102 = vmatpush.msra.mxu1 %v76_v5  ;;  %v157_v9 = vld [vmem:[%s346_s7 + $0x18] sm:$0xff]  ;;  %v203_v10 = vld [vmem:[%s343_s2] ss:$0 sm:$0xff]  ;;  %v116_v17 = vld [vmem:[%s345_s5 + $0x10] sm:$0xff] }
   0x5   :  { %195 = vmatmul.msk.f32.vlgmr.msra.gmra.mxu0 %vm42_vm0, %v34_v2  ;;  %140 = vmatpush.msra.mxu2 %v117_v8  ;;  %v156_v18 = vld [vmem:[%s346_s7 + $0x10] sm:$0xff]  ;;  %v115_v19 = vld [vmem:[%s345_s5 + $0x8] sm:$0xff]  ;;  %v114_v21 = vld [vmem:[%s345_s5] sm:$0xff] }
   0x6   :  { %103 = vmatpush.msra.mxu1 %v75_v6  ;;  %174 = vmatpush.msra.mxu3 %v157_v9  ;;  %v155_v20 = vld [vmem:[%s346_s7 + $0x8] sm:$0xff]  ;;  %v154_v22 = vld [vmem:[%s346_s7] sm:$0xff] }
   0x7   :  { %141 = vmatpush.msra.mxu2 %v116_v17  ;;  %v204_v23 = vld [vmem:[%s344_s4] ss:$0 sm:$0xff] }
   0x8   :  { %104 = vmatpush.msra.mxu1 %v74_v7  ;;  %175 = vmatpush.msra.mxu3 %v156_v18  ;;  %v205_v30 = vld [vmem:[%s347_s6] ss:$0 sm:$0xff] }
   0x9   :  { %142 = vmatpush.msra.mxu2 %v115_v19  ;;  %v206_v31 = vld [vmem:[%s348_s8] ss:$0 sm:$0xff] }
   0xa   :  { %176 = vmatpush.msra.mxu3 %v155_v20 }
   0xb   :  { %143 = vmatpush.msra.mxu2 %v114_v21 }
   0xc   :  { %177 = vmatpush.msra.mxu3 %v154_v22 }
   0xd   :  { %196 = vmatmul.msk.f32.gmra.mxu0 %vm42_vm0, %v35_v4 }
  0x82   :  { %v66_v11 = vpop.f32.mrf.mxu0 }
  0x83   :  { %v67_v12 = vadd.f32 %v203_v10, %v66_v11 }
  0x85   :  { %v72_v13 = vmax.f32 %v67_v12, 0.0 }
  0x87   :  { %197 = vmatmul.msk.f32.vlgmr.msra.gmra.mxu1 %vm82_vm1, %v72_v13 }
  0x8a   :  { %v69_v14 = vpop.f32.mrf.mxu0 }
  0x8b   :  { %v70_v15 = vadd.f32 %v203_v10, %v69_v14 }
  0x8d   :  { %v73_v16 = vmax.f32 %v70_v15, 0.0 }
  0x8f   :  { %198 = vmatmul.msk.f32.gmra.mxu1 %vm82_vm1, %v73_v16 }
 0x104   :  { %v106_v24 = vpop.f32.mrf.mxu1 }
 0x105   :  { %v107_v25 = vadd.f32 %v204_v23, %v106_v24 }
 0x107   :  { %v112_v26 = vmax.f32 %v107_v25, 0.0 }
 0x109   :  { %199 = vmatmul.msk.f32.vlgmr.msra.gmra.mxu2 %vm82_vm1, %v112_v26  ;;  %201 = vmatmul.msk.f32.vlgmr.msra.gmra.mxu3 %vm82_vm1, %v112_v26 }
 0x10c   :  { %v109_v27 = vpop.f32.mrf.mxu1 }
 0x10d   :  { %v110_v28 = vadd.f32 %v204_v23, %v109_v27 }
 0x10f   :  { %v113_v29 = vmax.f32 %v110_v28, 0.0 }
 0x111   :  { %200 = vmatmul.msk.f32.gmra.mxu2 %vm82_vm1, %v113_v29  ;;  %202 = vmatmul.msk.f32.gmra.mxu3 %vm82_vm1, %v113_v29 }
 0x18c   :  { %v145_v32 = vpop.f32.mrf.mxu2  ;;  %v179_v33 = vpop.f32.mrf.mxu3 }
 0x18d   :  { %v146_v34 = vadd.f32 %v205_v30, %v145_v32  ;;  %v180_v35 = vadd.f32 %v206_v31, %v179_v33 }
 0x18f   :  { %152 = vst.msk [vmem:[%s349_s9] sm:$0xff] %vm151_vm2, %v146_v34 }
 0x190   :  { %185 = vst.msk [vmem:[%s350_s10] sm:$0xff] %vm151_vm2, %v180_v35 }
 0x194   :  { %v148_v36 = vpop.f32.mrf.mxu2  ;;  %v182_v37 = vpop.f32.mrf.mxu3 }
 0x195   :  { %v149_v38 = vadd.f32 %v205_v30, %v148_v36  ;;  %v183_v39 = vadd.f32 %v206_v31, %v182_v37 }
 0x197   :  { %153 = vst.msk [vmem:[%s349_s9 + $0x8] sm:$0xff] %vm151_vm2, %v149_v38 }
 0x198   :  { %186 = vst.msk [vmem:[%s350_s10 + $0x8] sm:$0xff] %vm151_vm2, %v183_v39 }

</bundles_post_ra>
